<compile_context>
chip_gen: v7x
topology: tpu7x:2x2x1
jax: 0.10.0
libtpu: 0.0.40
codegen_flags: <defaults>
</compile_context>

<pallas_src>
import functools

import jax
import jax.numpy as jnp
from jax import lax
from jax.experimental import pallas as pl
from jax.experimental.pallas import tpu as pltpu

IN_FEATURES = 42   # fc1 input width (kept unpadded)
H1 = 128           # fc1 output width (already lane-aligned)
H2 = 64            # real fc2 output width
N_OUT = 5          # real fc3 output width

H2_PAD = 128       # fc2 output padded to 128 lanes
OUT_PAD = 8        # fc3 output padded to 8 sublanes (transposed layout)


def mlp_kernel(x_ref, w1_ref, b1_ref, w2_ref, b2_ref, w3t_ref, b3t_ref, o_ref):
    # x tile: (TB, 42) f32 -> bf16.  Weights/biases are the same VMEM-resident
    # block on every grid step.  Matmuls in bf16 with f32 accumulation; the
    # bias-add and ReLU epilogues stay in f32 (v5e has no bf16 VPU).
    x = x_ref[...].astype(jnp.bfloat16)                          # (TB, 42)

    h1 = jnp.dot(x, w1_ref[...], preferred_element_type=jnp.float32)
    h1 = jnp.maximum(h1 + b1_ref[...], 0.0)                      # (TB, 128) f32

    h2 = jnp.dot(h1.astype(jnp.bfloat16), w2_ref[...],
                 preferred_element_type=jnp.float32)
    h2 = jnp.maximum(h2 + b2_ref[...], 0.0)                      # (TB, 128) f32

    # Final GEMM transposed: (8, 128) x (TB, 128)^T -> (8, TB), so the output
    # slab is lane-dense along the batch dimension (no masked stores, 32 B/row).
    h3t = lax.dot_general(
        w3t_ref[...], h2.astype(jnp.bfloat16),
        dimension_numbers=(((1,), (1,)), ((), ())),
        preferred_element_type=jnp.float32)                      # (8, TB) f32
    o_ref[...] = (h3t + b3t_ref[...]).astype(o_ref.dtype)


@functools.partial(jax.jit, static_argnames=("tb",))
def _pallas_forward(x, prepared_params, *, tb):
    """x: (B, 42) float32 -> (B, 5) float32 logits, via the fused kernel."""
    w1, b1, w2, b2, w3t, b3t = prepared_params
    B = x.shape[0]
    bp = pl.cdiv(B, tb) * tb                    # batch padded to tile multiple

    # Pad only the batch dim (no lane padding of x); no-op when B % tb == 0.
    xp = x if bp == B else jnp.pad(x, ((0, bp - B), (0, 0)))

    flops = 2 * bp * (IN_FEATURES * H1 + H1 * H2_PAD + H2_PAD * OUT_PAD)
    bytes_accessed = (xp.size * 4                       # x (f32)
                      + (w1.size + w2.size + w3t.size) * 2   # bf16 weights
                      + (b1.size + b2.size + b3t.size) * 4   # f32 biases
                      + OUT_PAD * bp * 4)               # transposed f32 output

    out = pl.pallas_call(
        mlp_kernel,
        out_shape=jax.ShapeDtypeStruct((OUT_PAD, bp), jnp.float32),
        grid_spec=pl.GridSpec(
            grid=(bp // tb,),
            in_specs=[
                pl.BlockSpec((tb, IN_FEATURES), lambda i: (i, 0)),   # x tile
                pl.BlockSpec((IN_FEATURES, H1), lambda i: (0, 0)),   # w1 (resident)
                pl.BlockSpec((1, H1), lambda i: (0, 0)),             # b1
                pl.BlockSpec((H1, H2_PAD), lambda i: (0, 0)),        # w2
                pl.BlockSpec((1, H2_PAD), lambda i: (0, 0)),         # b2
                pl.BlockSpec((OUT_PAD, H2_PAD), lambda i: (0, 0)),   # w3 transposed
                pl.BlockSpec((OUT_PAD, 1), lambda i: (0, 0)),        # b3 transposed
            ],
            out_specs=pl.BlockSpec((OUT_PAD, tb), lambda i: (0, i)), # lane-dense
        ),
        compiler_params=pltpu.CompilerParams(
            dimension_semantics=("parallel",),   # shard batch tiles on v7x megacore
        ),
        cost_estimate=pl.CostEstimate(
            flops=flops, transcendentals=0, bytes_accessed=bytes_accessed),
    )(xp, w1, b1, w2, b2, w3t, b3t)

    return out[:N_OUT, :B].T


@jax.jit
def _small_batch_forward(x, prepared_params):
    """Plain-XLA fallback for tiny batches (pallas_call fixed cost dominates)."""
    w1, b1, w2, b2, w3t, b3t = prepared_params
    h = jnp.dot(x.astype(jnp.bfloat16), w1, preferred_element_type=jnp.float32)
    h = jnp.maximum(h + b1, 0.0)
    h = jnp.dot(h.astype(jnp.bfloat16), w2, preferred_element_type=jnp.float32)
    h = jnp.maximum(h + b2, 0.0)
    h3t = lax.dot_general(w3t, h.astype(jnp.bfloat16),
                          dimension_numbers=(((1,), (1,)), ((), ())),
                          preferred_element_type=jnp.float32) + b3t
    return h3t[:N_OUT].T


def sign_language_model(x, prepared_params, *, preferred_tb=512):
    """Dispatch: plain XLA for tiny batches, fused Pallas kernel otherwise."""
    B = x.shape[0]
    if B < 128:
        return _small_batch_forward(x, prepared_params)
    # Pick the batch tile: start at preferred_tb, halve (staying a multiple of
    # 128) until the grid has >= 2 steps so both v7x TensorCores get work.
    tb = preferred_tb
    while tb > 128 and pl.cdiv(B, tb) < 2:
        tb //= 2
    return _pallas_forward(x, prepared_params, tb=tb)


def init_params(key):
    """Unpadded f32 parameters matching nn.Linear shapes, stored as (in, out).

    fc1: (42 -> 128), fc2: (128 -> 64), fc3: (64 -> 5).  Biases as (1, out).
    """
    k1, k2, k3, k4, k5, k6 = jax.random.split(key, 6)

    def uinit(k, fan_in, shape):
        bound = 1.0 / jnp.sqrt(fan_in)
        return jax.random.uniform(k, shape, jnp.float32, -bound, bound)

    w1 = uinit(k1, 42, (42, 128))
    b1 = uinit(k2, 42, (1, 128))
    w2 = uinit(k3, 128, (128, 64))
    b2 = uinit(k4, 128, (1, 64))
    w3 = uinit(k5, 64, (64, 5))
    b3 = uinit(k6, 64, (1, 5))
    return (w1, b1, w2, b2, w3, b3)


def prepare_params(params):
    """One-time layout prep.

    w1 stays at its real (42, 128) shape (x is fed unpadded and cast in-kernel).
    w2's output lanes are zero-padded 64 -> 128; w3 is transposed and padded to
    (8, 128) so the final GEMM produces a lane-dense (8, batch) output slab.
    Zero padding is exact: padded h2 columns are relu(0 + 0) = 0 and the
    corresponding w3_t columns are zero, so valid logits are unchanged.
    """
    w1, b1, w2, b2, w3, b3 = params

    w1p = w1.astype(jnp.bfloat16)                                    # (42, 128)
    w2p = jnp.zeros((H1, H2_PAD), jnp.float32).at[:, :H2].set(w2)    # (128, 128)
    w3t = jnp.zeros((OUT_PAD, H2_PAD), jnp.float32).at[:N_OUT, :H2].set(w3.T)

    b1p = b1.astype(jnp.float32)                                     # (1, 128)
    b2p = jnp.zeros((1, H2_PAD), jnp.float32).at[:, :H2].set(b2)     # (1, 128)
    b3t = jnp.zeros((OUT_PAD, 1), jnp.float32).at[:N_OUT, 0].set(b3[0])

    return (w1p, b1p,
            w2p.astype(jnp.bfloat16), b2p,
            w3t.astype(jnp.bfloat16), b3t)


def reference_forward(x, params):
    """Pure-JAX reference with matching precision (bf16 matmuls, f32 accum)."""
    w1, b1, w2, b2, w3, b3 = params
    h = jnp.dot(x.astype(jnp.bfloat16), w1.astype(jnp.bfloat16),
                preferred_element_type=jnp.float32)
    h = jnp.maximum(h + b1, 0.0)
    h = jnp.dot(h.astype(jnp.bfloat16), w2.astype(jnp.bfloat16),
                preferred_element_type=jnp.float32)
    h = jnp.maximum(h + b2, 0.0)
    h = jnp.dot(h.astype(jnp.bfloat16), w3.astype(jnp.bfloat16),
                preferred_element_type=jnp.float32)
    return h + b3


if __name__ == "__main__":
    key = jax.random.PRNGKey(0)
    pkey, xkey = jax.random.split(key)

    params = init_params(pkey)
    prepared = prepare_params(params)

    # B=200 is deliberately not a multiple of the 128-row batch tile:
    # exercises wrapper-side batch padding and a 2-step pipelined grid.
    B = 200
    x = jax.random.normal(xkey, (B, IN_FEATURES), dtype=jnp.float32)

    out = sign_language_model(x, prepared)
    out = jax.block_until_ready(out)

    ref = reference_forward(x, params)
    assert out.shape == (B, N_OUT), out.shape
    assert jnp.allclose(out, ref, atol=1e-4, rtol=1e-4), "mismatch vs reference"

    # Tiny-batch fallback path parity check.
    out_small = jax.block_until_ready(sign_language_model(x[:16], prepared))
    assert out_small.shape == (16, N_OUT), out_small.shape
    assert jnp.allclose(out_small, ref[:16], atol=1e-4, rtol=1e-4), \
        "fallback mismatch vs reference"

    print("KERNEL_OK")
</pallas_src>

<mosaic_0001>
module attributes {stable_mosaic.version = 11 : i64} {
  func.func @mlp_kernel(%arg0: i32, %arg1: memref<128x42xf32, #tpu.memory_space<vmem>>, %arg2: memref<42x128xbf16, #tpu.memory_space<vmem>>, %arg3: memref<1x128xf32, #tpu.memory_space<vmem>>, %arg4: memref<128x128xbf16, #tpu.memory_space<vmem>>, %arg5: memref<1x128xf32, #tpu.memory_space<vmem>>, %arg6: memref<8x128xbf16, #tpu.memory_space<vmem>>, %arg7: memref<8x1xf32, #tpu.memory_space<vmem>>, %arg8: memref<8x128xf32, #tpu.memory_space<vmem>>) attributes {dimension_semantics = [#tpu.dimension_semantics<parallel>], iteration_bounds = array<i64: 2>, scalar_prefetch = 0 : i64, scratch_operands = 0 : i64, tpu.core_type = #tpu.core_type<tc>, window_params = [{transform_indices = @transform_0, window_bounds = array<i64: 128, 42>}, {pipeline_mode = #tpu.pipeline_mode<synchronous>, transform_indices = @transform_1, window_bounds = array<i64: 42, 128>}, {pipeline_mode = #tpu.pipeline_mode<synchronous>, transform_indices = @transform_2, window_bounds = array<i64: 1, 128>}, {pipeline_mode = #tpu.pipeline_mode<synchronous>, transform_indices = @transform_3, window_bounds = array<i64: 128, 128>}, {pipeline_mode = #tpu.pipeline_mode<synchronous>, transform_indices = @transform_4, window_bounds = array<i64: 1, 128>}, {pipeline_mode = #tpu.pipeline_mode<synchronous>, transform_indices = @transform_5, window_bounds = array<i64: 8, 128>}, {pipeline_mode = #tpu.pipeline_mode<synchronous>, transform_indices = @transform_6, window_bounds = array<i64: 8, 1>}, {transform_indices = @transform_7, window_bounds = array<i64: 8, 128>}]} {
    %c0 = arith.constant 0 : index
    %c0_0 = arith.constant 0 : index
    %0 = vector.load %arg1[%c0, %c0_0] : memref<128x42xf32, #tpu.memory_space<vmem>>, vector<128x42xf32>
    %1 = arith.truncf %0 : vector<128x42xf32> to vector<128x42xbf16>
    %c0_1 = arith.constant 0 : index
    %c0_2 = arith.constant 0 : index
    %2 = vector.load %arg2[%c0_1, %c0_2] : memref<42x128xbf16, #tpu.memory_space<vmem>>, vector<42x128xbf16>
    %cst = arith.constant dense<0.000000e+00> : vector<128x128xf32>
    %3 = tpu.matmul %1, %2, %cst {dimension_numbers = #tpu.dot_dimension_numbers<[1], [0], [0], [1], [0, 0, 1, 1], [], []>} : vector<128x42xbf16>, vector<42x128xbf16>, vector<128x128xf32> -> vector<128x128xf32>
    %c0_3 = arith.constant 0 : index
    %c0_4 = arith.constant 0 : index
    %4 = vector.load %arg3[%c0_3, %c0_4] : memref<1x128xf32, #tpu.memory_space<vmem>>, vector<1x128xf32>
    %5 = vector.broadcast %4 : vector<1x128xf32> to vector<128x128xf32>
    %6 = arith.addf %3, %5 : vector<128x128xf32>
    %cst_5 = arith.constant 0.000000e+00 : f32
    %7 = vector.broadcast %cst_5 : f32 to vector<128x128xf32>
    %8 = arith.maximumf %6, %7 : vector<128x128xf32>
    %9 = arith.truncf %8 : vector<128x128xf32> to vector<128x128xbf16>
    %c0_6 = arith.constant 0 : index
    %c0_7 = arith.constant 0 : index
    %10 = vector.load %arg4[%c0_6, %c0_7] : memref<128x128xbf16, #tpu.memory_space<vmem>>, vector<128x128xbf16>
    %cst_8 = arith.constant dense<0.000000e+00> : vector<128x128xf32>
    %11 = tpu.matmul %9, %10, %cst_8 {dimension_numbers = #tpu.dot_dimension_numbers<[1], [0], [0], [1], [0, 0, 1, 1], [], []>} : vector<128x128xbf16>, vector<128x128xbf16>, vector<128x128xf32> -> vector<128x128xf32>
    %c0_9 = arith.constant 0 : index
    %c0_10 = arith.constant 0 : index
    %12 = vector.load %arg5[%c0_9, %c0_10] : memref<1x128xf32, #tpu.memory_space<vmem>>, vector<1x128xf32>
    %13 = vector.broadcast %12 : vector<1x128xf32> to vector<128x128xf32>
    %14 = arith.addf %11, %13 : vector<128x128xf32>
    %cst_11 = arith.constant 0.000000e+00 : f32
    %15 = vector.broadcast %cst_11 : f32 to vector<128x128xf32>
    %16 = arith.maximumf %14, %15 : vector<128x128xf32>
    %c0_12 = arith.constant 0 : index
    %c0_13 = arith.constant 0 : index
    %17 = vector.load %arg6[%c0_12, %c0_13] : memref<8x128xbf16, #tpu.memory_space<vmem>>, vector<8x128xbf16>
    %18 = arith.truncf %16 : vector<128x128xf32> to vector<128x128xbf16>
    %cst_14 = arith.constant dense<0.000000e+00> : vector<8x128xf32>
    %19 = tpu.matmul %17, %18, %cst_14 {dimension_numbers = #tpu.dot_dimension_numbers<[1], [1], [0], [0], [0, 0, 1, 0], [], []>} : vector<8x128xbf16>, vector<128x128xbf16>, vector<8x128xf32> -> vector<8x128xf32>
    %c0_15 = arith.constant 0 : index
    %c0_16 = arith.constant 0 : index
    %20 = vector.load %arg7[%c0_15, %c0_16] : memref<8x1xf32, #tpu.memory_space<vmem>>, vector<8x1xf32>
    %21 = vector.broadcast %20 : vector<8x1xf32> to vector<8x128xf32>
    %22 = arith.addf %19, %21 : vector<8x128xf32>
    %c0_17 = arith.constant 0 : index
    %c0_18 = arith.constant 0 : index
    %23 = vector.load %arg8[%c0_17, %c0_18] : memref<8x128xf32, #tpu.memory_space<vmem>>, vector<8x128xf32>
    tpu.vector_store %arg8[%c0_17, %c0_18], %22 {strides = array<i32>} : memref<8x128xf32, #tpu.memory_space<vmem>>, vector<8x128xf32>,
    return
  }
  func.func @transform_0(%arg0: i32) -> (i32, i32) {
    %c0_i32 = arith.constant 0 : i32
    %c0_i32_0 = arith.constant 0 : i32
    return %arg0, %c0_i32 : i32, i32
  }
  func.func @transform_1(%arg0: i32) -> (i32, i32) {
    %c0_i32 = arith.constant 0 : i32
    %c0_i32_0 = arith.constant 0 : i32
    %c0_i32_1 = arith.constant 0 : i32
    return %c0_i32, %c0_i32_0 : i32, i32
  }
  func.func @transform_2(%arg0: i32) -> (i32, i32) {
    %c0_i32 = arith.constant 0 : i32
    %c0_i32_0 = arith.constant 0 : i32
    %c0_i32_1 = arith.constant 0 : i32
    return %c0_i32, %c0_i32_0 : i32, i32
  }
  func.func @transform_3(%arg0: i32) -> (i32, i32) {
    %c0_i32 = arith.constant 0 : i32
    %c0_i32_0 = arith.constant 0 : i32
    %c0_i32_1 = arith.constant 0 : i32
    return %c0_i32, %c0_i32_0 : i32, i32
  }
  func.func @transform_4(%arg0: i32) -> (i32, i32) {
    %c0_i32 = arith.constant 0 : i32
    %c0_i32_0 = arith.constant 0 : i32
    %c0_i32_1 = arith.constant 0 : i32
    return %c0_i32, %c0_i32_0 : i32, i32
  }
  func.func @transform_5(%arg0: i32) -> (i32, i32) {
    %c0_i32 = arith.constant 0 : i32
    %c0_i32_0 = arith.constant 0 : i32
    %c0_i32_1 = arith.constant 0 : i32
    return %c0_i32, %c0_i32_0 : i32, i32
  }
  func.func @transform_6(%arg0: i32) -> (i32, i32) {
    %c0_i32 = arith.constant 0 : i32
    %c0_i32_0 = arith.constant 0 : i32
    %c0_i32_1 = arith.constant 0 : i32
    return %c0_i32, %c0_i32_0 : i32, i32
  }
  func.func @transform_7(%arg0: i32) -> (i32, i32) {
    %c0_i32 = arith.constant 0 : i32
    %c0_i32_0 = arith.constant 0 : i32
    return %c0_i32, %arg0 : i32, i32
  }
}

</mosaic_0001>

<bundles_post_ra>
// kernel: _pallas_forward.1
= control target key start
LH: loop header
LB: loop body
LE: loop exit
PB: predicated region body
PF: predicated region fallthrough
CT: control target
= control target key end

     0   :  { %s993_s24 = smov 0   ;;  %s1095_s0 = inlined_call_operand.vmem [shape: f32[256,42], index: 0, kind: input, shape index: {}]   ;;  %s1096_s1 = inlined_call_operand.vmem [shape: bf16[42,128], index: 1, kind: input, shape index: {}]   ;;  %s1097_s2 = inlined_call_operand.vmem [shape: f32[1,128], index: 2, kind: input, shape index: {}]   ;;  %s1098_s3 = inlined_call_operand.vmem [shape: bf16[128,128], index: 3, kind: input, shape index: {}]   ;;  %s1099_s4 = inlined_call_operand.vmem [shape: f32[1,128], index: 4, kind: input, shape index: {}]   ;;  %s1100_s5 = inlined_call_operand.vmem [shape: bf16[8,128], index: 5, kind: input, shape index: {}]   ;;  %s1101_s6 = inlined_call_operand.vmem [shape: f32[8,1], index: 6, kind: input, shape index: {}]   ;;  %s1102_s7 = inlined_call_operand.vmem [shape: f32[8,256], index: 7, kind: output, shape index: {}]  }
   0x1 LB: > { %s999_s25 = sadd.s32 4294967295, %s948_s24   ;;  %p781_p0 = scmp.ge.s32.totalorder %s948_s24, 1  ;;  %s948_s24 = sphi %s993_s24, %s17_s24  }
   0x2   : > { %p238_p1 = scmp.lt.s32.totalorder %s948_s24, 3 }
   0x4   : > { %p239_p2 = pnand %p781_p0, %p238_p1 }
   0x5   : > { %v931_v0 = vld [vmem:[%s1096_s1] sm:$0xff] (!%p239_p2)   ;;  %v932_v1 = vld [vmem:[%s1096_s1 + $0x8] sm:$0xff] (!%p239_p2)   ;;  %s782_s30 = sshll.u32 (!%p239_p2), %s999_s25, 4  ;;  %v933_v2 = vld [vmem:[%s1096_s1 + $0x10] sm:$0x1f] (!%p239_p2)   ;;  %vm359_vm0 = vcmask (!%p239_p2), 1044480  }
   0x6   : > { %242 = sbr.rel (%p239_p2) target bundleno = 741 (0x2e5), region = 48  ;;  %844 = vmatprep.subr.bf16.mxu1 (!%p239_p2), %v931_v0  ;;  %p270_p3 = scmp.lt.s32.totalorder (!%p239_p2), %s782_s30, 31  ;;  %v361_v3 = vsel (!%p239_p2), %vm359_vm0, %v933_v2, 0  ;;  %v934_v4 = vld [vmem:[%s1098_s3] sm:$0xff] (!%p239_p2)   ;;  %vm334_vm1 = vcmask (!%p239_p2), 343040   ;;  %v935_v14 = vld [vmem:[%s1098_s3 + $0x8] sm:$0xff] (!%p239_p2)  }
   0x7   : > { %845 = vmatpush3.bf16.msra.mxu1 (!%p239_p2), %v931_v0  ;;  %v936_v19 = vld [vmem:[%s1098_s3 + $0x10] sm:$0xff] (!%p239_p2)   ;;  %v937_v22 = vld [vmem:[%s1098_s3 + $0x18] sm:$0xff] (!%p239_p2)   ;;  %v938_v27 = vld [vmem:[%s1098_s3 + $0x20] sm:$0xff] (!%p239_p2)   ;;  %vm951_vm2 = vmmov (!%p239_p2), 0   ;;  %p275_p4 = scmp.lt.s32.totalorder (!%p239_p2), %s999_s25, 1 }
   0x8   : > { %846 = vmatprep.subr.bf16.mxu1 (!%p239_p2), %v932_v1  ;;  %v939_v30 = vld [vmem:[%s1098_s3 + $0x28] sm:$0xff] (!%p239_p2)   ;;  %v940_v34 = vld [vmem:[%s1098_s3 + $0x30] sm:$0xff] (!%p239_p2)   ;;  %v941_v35 = vld [vmem:[%s1098_s3 + $0x38] sm:$0xff] (!%p239_p2)  }
   0x9   : > { %v785_v36 = vld [vmem:[%s1097_s2] ss:$0 sm:$0xff] (!%p239_p2) }
   0xb   : > { %847 = vmatpush3.bf16.msra.mxu1 (!%p239_p2), %v932_v1 }
   0xc   : > { %918 = vmatprep.subr.msk.bf16.mxu1 (!%p239_p2), %vm359_vm0, %v933_v2 }
   0xd   : > { %s1104_s30 = smov (!%p270_p3, %s782_s30), 31  ;;  %s1106_s25 = smov (!%p275_p4, %s999_s25), 1 }
   0xe   : > { %s783_s10 = sshll.u32 %s1104_s30, 3  ;;  %s784_s17 = sshll.u32 %s1106_s25, 3 }
   0xf   : > { %s1016_s13 = scalar_lea.vmem %s1095_s0, %s783_s10  ;;  %849 = vmatpush3.bf16.msra.mxu1 %v361_v3  ;;  %s278_s20 = scalar_lea.vmem %s1102_s7, %s784_s17 }
  0x10   : > { %v280_v5 = vld [vmem:[%s1016_s13] sm:$0xff]  ;;  %v281_v6 = vld [vmem:[%s1016_s13 + $0x8] sm:$0xff]  ;;  %v282_v7 = vld [vmem:[%s1016_s13 + $0x10] sm:$0xff]  ;;  %866 = vmatprep.subr.bf16.mxu1 %v934_v4 }
  0x11   : > { %v296_v8 = vpack.c.bf16 %v281_v6, %v280_v5  ;;  %v283_v9 = vld [vmem:[%s1016_s13 + $0x18] sm:$0xff]  ;;  %v284_v10 = vld [vmem:[%s1016_s13 + $0x20] sm:$0xff]  ;;  %v285_v11 = vld [vmem:[%s1016_s13 + $0x28] sm:$0xff] }
  0x12   : > { %v297_v12 = vpack.c.bf16 %v283_v9, %v282_v7  ;;  %v298_v13 = vpack.c.bf16 %v285_v11, %v284_v10  ;;  %v286_v15 = vld [vmem:[%s1016_s13 + $0x30] sm:$0xff]  ;;  %v287_v16 = vld [vmem:[%s1016_s13 + $0x38] sm:$0xff]  ;;  %v288_v17 = vld [vmem:[%s1016_s13 + $0x40] sm:$0xff] }
  0x13   : > { %850 = vmatprep.mubr.msk.bf16.mxu1 %vm334_vm1, %v296_v8  ;;  %v289_v18 = vld [vmem:[%s1016_s13 + $0x48] sm:$0xff]  ;;  %v299_v20 = vpack.c.bf16 %v287_v16, %v286_v15  ;;  %v290_v23 = vld [vmem:[%s1016_s13 + $0x50] sm:$0xff]  ;;  %v291_v24 = vld [vmem:[%s1016_s13 + $0x58] sm:$0xff] }
  0x14   : > { %851 = vmatmul.mubr.msk.bf16.vlgmr.msra.gmra.mrb[0].mxu1 %vm334_vm1, %v297_v12  ;;  %v300_v21 = vpack.c.bf16 %v289_v18, %v288_v17  ;;  %v292_v25 = vld [vmem:[%s1016_s13 + $0x60] sm:$0xff]  ;;  %v293_v26 = vld [vmem:[%s1016_s13 + $0x68] sm:$0xff]  ;;  %v301_v28 = vpack.c.bf16 %v291_v24, %v290_v23  ;;  %v294_v31 = vld [vmem:[%s1016_s13 + $0x70] sm:$0xff] }
  0x15   : > { %854 = vmatprep.mubr.msk.bf16.mxu1 %vm334_vm1, %v298_v13  ;;  %867 = vmatpush3.bf16.msra.mxu1 %v934_v4  ;;  %v302_v29 = vpack.c.bf16 %v293_v26, %v292_v25  ;;  %v295_v32 = vld [vmem:[%s1016_s13 + $0x78] sm:$0xff] }
  0x16   : > { %868 = vmatprep.subr.bf16.mxu1 %v935_v14  ;;  %v303_v33 = vpack.c.bf16 %v295_v32, %v294_v31  ;;  %v952_v31 = vmov 0   ;;  %v797_v32 = vld [vmem:[%s1099_s4] ss:$0 sm:$0xff] }
  0x17   : > { %930 = vset.pattern.permute.xlu0 %v952_v31 }
  0x19   : > { %869 = vmatpush3.bf16.msra.mxu1 %v935_v14 }
  0x1a   : > { %870 = vmatprep.subr.bf16.mxu1 %v936_v19 }
  0x1c   : > { %855 = vmatmul.mubr.msk.bf16.gmra.mrb[4].mxu1 %vm334_vm1, %v299_v20 }
  0x1d   : > { %858 = vmatprep.mubr.msk.bf16.mxu1 %vm334_vm1, %v300_v21  ;;  %871 = vmatpush3.bf16.msra.mxu1 %v936_v19 }
  0x1e   : > { %872 = vmatprep.subr.bf16.mxu1 %v937_v22 }
  0x21   : > { %873 = vmatpush3.bf16.msra.mxu1 %v937_v22 }
  0x22   : > { %874 = vmatprep.subr.bf16.mxu1 %v938_v27 }
  0x24   : > { %859 = vmatmul.mubr.msk.bf16.gmra.mrb[8].mxu1 %vm334_vm1, %v301_v28 }
  0x25   : > { %862 = vmatprep.mubr.msk.bf16.mxu1 %vm334_vm1, %v302_v29  ;;  %875 = vmatpush3.bf16.msra.mxu1 %v938_v27  ;;  %v950_v29 = vmov 0.0  }
  0x26   : > { %876 = vmatprep.subr.bf16.mxu1 %v939_v30  ;;  %898 = vmatprep.subr.bf16.mxu0 %v950_v29 }
  0x27   : > { %914 = vmatprep.mubr.msk.bf16.mxu0 %vm951_vm2, %v950_v29 }
  0x29   : > { %877 = vmatpush3.bf16.msra.mxu1 %v939_v30  ;;  %v677_v30 = vld [vmem:[%s1101_s6] sm:$0xff] }
  0x2a   : > { %878 = vmatprep.subr.bf16.mxu1 %v940_v34  ;;  %680 = vperm.xlu0 %930, %v677_v30  }
  0x2c   : > { %863 = vmatmul.mubr.msk.bf16.gmra.mrb[12].mxu1 %vm334_vm1, %v303_v33 }
  0x2d   : > { %879 = vmatpush3.bf16.msra.mxu1 %v940_v34 }
  0x2e   : > { %880 = vmatprep.subr.bf16.mxu1 %v941_v35 }
  0x31   : > { %881 = vmatpush3.bf16.msra.mxu1 %v941_v35 }
  0xe7   : > { %v852_v37 = vpop.f32.mrb[0].mxu1 }
  0xe8   : > { %v406_v38 = vadd.f32 %v852_v37, %v785_v36  ;;  %v397_v39 = vpop.f32.mrb[1].mxu1 }
  0xe9   : > { %v398_v40 = vadd.f32 %v785_v36, %v397_v39  ;;  %v853_v41 = vpop.f32.mrb[2].mxu1 }
  0xea   : > { %v409_v42 = vadd.f32 %v853_v41, %v785_v36  ;;  %v400_v43 = vpop.f32.mrb[3].mxu1  ;;  %v462_v45 = vmax.f32 %v406_v38, 0.0 }
  0xeb   : > { %v401_v44 = vadd.f32 %v785_v36, %v400_v43  ;;  %v460_v47 = vmax.f32 %v398_v40, 0.0 }
  0xec   : > { %v463_v46 = vmax.f32 %v409_v42, 0.0 }
  0xed   : > { %v461_v48 = vmax.f32 %v401_v44, 0.0 }
  0xee   : > { %v477_v49 = vpack.c.bf16 %v463_v46, %v462_v45 }
  0xef   : > { %v476_v50 = vpack.c.bf16 %v461_v48, %v460_v47  ;;  %v856_v51 = vpop.f32.mrb[4].mxu1 }
  0xf0   : > { %v422_v52 = vadd.f32 %v856_v51, %v785_v36  ;;  %v413_v53 = vpop.f32.mrb[5].mxu1 }
  0xf1   : > { %v414_v54 = vadd.f32 %v785_v36, %v413_v53  ;;  %882 = vmatprep.mubr.bf16.mxu1 %v476_v50  ;;  %v857_v55 = vpop.f32.mrb[6].mxu1 }
  0xf2   : > { %v466_v56 = vmax.f32 %v422_v52, 0.0  ;;  %v425_v57 = vadd.f32 %v857_v55, %v785_v36  ;;  %883 = vmatmul.mubr.bf16.vlgmr.msra.gmra.mrb[16].mxu1 %v477_v49  ;;  %v416_v58 = vpop.f32.mrb[7].mxu1 }
  0xf3   : > { %v464_v59 = vmax.f32 %v414_v54, 0.0  ;;  %v417_v60 = vadd.f32 %v785_v36, %v416_v58 }
  0xf4   : > { %v467_v61 = vmax.f32 %v425_v57, 0.0 }
  0xf5   : > { %v465_v62 = vmax.f32 %v417_v60, 0.0 }
  0xf6   : > { %v479_v63 = vpack.c.bf16 %v467_v61, %v466_v56 }
  0xf7   : > { %v478_v0 = vpack.c.bf16 %v465_v62, %v464_v59  ;;  %v860_v1 = vpop.f32.mrb[8].mxu1 }
  0xf8   : > { %v438_v2 = vadd.f32 %v860_v1, %v785_v36  ;;  %v429_v3 = vpop.f32.mrb[9].mxu1 }
  0xf9   : > { %886 = vmatprep.mubr.bf16.mxu1 %v478_v0  ;;  %v430_v4 = vadd.f32 %v785_v36, %v429_v3  ;;  %v861_v5 = vpop.f32.mrb[10].mxu1 }
  0xfa   : > { %887 = vmatmul.mubr.bf16.gmra.mrb[20].mxu1 %v479_v63  ;;  %v470_v6 = vmax.f32 %v438_v2, 0.0  ;;  %v441_v7 = vadd.f32 %v861_v5, %v785_v36  ;;  %v432_v8 = vpop.f32.mrb[11].mxu1 }
  0xfb   : > { %v468_v9 = vmax.f32 %v430_v4, 0.0  ;;  %v433_v10 = vadd.f32 %v785_v36, %v432_v8 }
  0xfc   : > { %v471_v11 = vmax.f32 %v441_v7, 0.0 }
  0xfd   : > { %v469_v12 = vmax.f32 %v433_v10, 0.0 }
  0xfe   : > { %v481_v13 = vpack.c.bf16 %v471_v11, %v470_v6 }
  0xff   : > { %v480_v14 = vpack.c.bf16 %v469_v12, %v468_v9  ;;  %v864_v15 = vpop.f32.mrb[12].mxu1 }
 0x100   : > { %v454_v16 = vadd.f32 %v864_v15, %v785_v36  ;;  %v445_v17 = vpop.f32.mrb[13].mxu1 }
 0x101   : > { %890 = vmatprep.mubr.bf16.mxu1 %v480_v14  ;;  %v446_v18 = vadd.f32 %v785_v36, %v445_v17  ;;  %v865_v19 = vpop.f32.mrb[14].mxu1 }
 0x102   : > { %891 = vmatmul.mubr.bf16.gmra.mrb[24].mxu1 %v481_v13  ;;  %v474_v20 = vmax.f32 %v454_v16, 0.0  ;;  %v457_v21 = vadd.f32 %v865_v19, %v785_v36  ;;  %v448_v22 = vpop.f32.mrb[15].mxu1 }
 0x103   : > { %v472_v23 = vmax.f32 %v446_v18, 0.0  ;;  %v449_v24 = vadd.f32 %v785_v36, %v448_v22 }
 0x104   : > { %v475_v25 = vmax.f32 %v457_v21, 0.0 }
 0x105   : > { %v473_v26 = vmax.f32 %v449_v24, 0.0 }
 0x106   : > { %v483_v27 = vpack.c.bf16 %v475_v25, %v474_v20  ;;  %v668_v25 = vld [vmem:[%s1100_s5] sm:$0xf] }
 0x107   : > { %v482_v28 = vpack.c.bf16 %v473_v26, %v472_v23  ;;  %v681_v26 = vpop.permute.xlu0 %680 }
 0x109   : > { %894 = vmatprep.mubr.bf16.mxu1 %v482_v28 }
 0x10a   : > { %895 = vmatmul.mubr.bf16.gmra.mrb[28].mxu1 %v483_v27 }
 0x1c5   : > { %v884_v33 = vpop.f32.mrb[16].mxu1 }
 0x1c6   : > { %v598_v34 = vadd.f32 %v884_v33, %v797_v32  ;;  %v589_v35 = vpop.f32.mrb[17].mxu1 }
 0x1c7   : > { %v590_v36 = vadd.f32 %v797_v32, %v589_v35  ;;  %v885_v37 = vpop.f32.mrb[18].mxu1 }
 0x1c8   : > { %v601_v38 = vadd.f32 %v885_v37, %v797_v32  ;;  %v592_v39 = vpop.f32.mrb[19].mxu1  ;;  %v654_v41 = vmax.f32 %v598_v34, 0.0 }
 0x1c9   : > { %v593_v40 = vadd.f32 %v797_v32, %v592_v39  ;;  %v652_v43 = vmax.f32 %v590_v36, 0.0 }
 0x1ca   : > { %v655_v42 = vmax.f32 %v601_v38, 0.0 }
 0x1cb   : > { %v653_v44 = vmax.f32 %v593_v40, 0.0 }
 0x1cc   : > { %v670_v45 = vpack.c.bf16 %v655_v42, %v654_v41 }
 0x1cd   : > { %v888_v46 = vpop.f32.mrb[20].mxu1  ;;  %v669_v47 = vpack.c.bf16 %v653_v44, %v652_v43 }
 0x1ce   : > { %v614_v48 = vadd.f32 %v888_v46, %v797_v32  ;;  %v605_v49 = vpop.f32.mrb[21].mxu1 }
 0x1cf   : > { %v606_v50 = vadd.f32 %v797_v32, %v605_v49  ;;  %899 = vmatpush3.bf16.xpose.msra.mxu0 %v669_v47  ;;  %v889_v51 = vpop.f32.mrb[22].mxu1 }
 0x1d0   : > { %v658_v52 = vmax.f32 %v614_v48, 0.0  ;;  %v617_v53 = vadd.f32 %v889_v51, %v797_v32  ;;  %v608_v54 = vpop.f32.mrb[23].mxu1  ;;  %900 = vmatprep.subr.bf16.mxu0 %v950_v29 }
 0x1d1   : > { %v656_v55 = vmax.f32 %v606_v50, 0.0  ;;  %v609_v56 = vadd.f32 %v797_v32, %v608_v54 }
 0x1d2   : > { %v659_v57 = vmax.f32 %v617_v53, 0.0 }
 0x1d3   : > { %v657_v58 = vmax.f32 %v609_v56, 0.0 }
 0x1d4   : > { %v672_v59 = vpack.c.bf16 %v659_v57, %v658_v52 }
 0x1d5   : > { %v671_v60 = vpack.c.bf16 %v657_v58, %v656_v55  ;;  %v892_v61 = vpop.f32.mrb[24].mxu1 }
 0x1d6   : > { %v630_v62 = vadd.f32 %v892_v61, %v797_v32  ;;  %v621_v63 = vpop.f32.mrb[25].mxu1 }
 0x1d7   : > { %901 = vmatpush3.bf16.xpose.msra.mxu0 %v670_v45  ;;  %v622_v0 = vadd.f32 %v797_v32, %v621_v63  ;;  %v893_v1 = vpop.f32.mrb[26].mxu1 }
 0x1d8   : > { %v662_v2 = vmax.f32 %v630_v62, 0.0  ;;  %902 = vmatprep.subr.bf16.mxu0 %v950_v29  ;;  %v633_v3 = vadd.f32 %v893_v1, %v797_v32  ;;  %v624_v4 = vpop.f32.mrb[27].mxu1 }
 0x1d9   : > { %v660_v5 = vmax.f32 %v622_v0, 0.0  ;;  %v625_v6 = vadd.f32 %v797_v32, %v624_v4 }
 0x1da   : > { %v663_v7 = vmax.f32 %v633_v3, 0.0 }
 0x1db   : > { %v661_v8 = vmax.f32 %v625_v6, 0.0 }
 0x1dc   : > { %v674_v9 = vpack.c.bf16 %v663_v7, %v662_v2 }
 0x1dd   : > { %v673_v10 = vpack.c.bf16 %v661_v8, %v660_v5  ;;  %v896_v11 = vpop.f32.mrb[28].mxu1 }
 0x1de   : > { %v646_v12 = vadd.f32 %v896_v11, %v797_v32  ;;  %v637_v13 = vpop.f32.mrb[29].mxu1 }
 0x1df   : > { %903 = vmatpush3.bf16.xpose.msra.mxu0 %v671_v60  ;;  %v638_v14 = vadd.f32 %v797_v32, %v637_v13  ;;  %v897_v15 = vpop.f32.mrb[30].mxu1 }
 0x1e0   : > { %904 = vmatprep.subr.bf16.mxu0 %v950_v29  ;;  %v666_v16 = vmax.f32 %v646_v12, 0.0  ;;  %v649_v17 = vadd.f32 %v897_v15, %v797_v32  ;;  %v640_v18 = vpop.f32.mrb[31].mxu1 }
 0x1e1   : > { %v664_v19 = vmax.f32 %v638_v14, 0.0  ;;  %v641_v20 = vadd.f32 %v797_v32, %v640_v18 }
 0x1e2   : > { %v667_v21 = vmax.f32 %v649_v17, 0.0 }
 0x1e3   : > { %v665_v22 = vmax.f32 %v641_v20, 0.0 }
 0x1e4   : > { %v676_v23 = vpack.c.bf16 %v667_v21, %v666_v16 }
 0x1e5   : > { %v675_v24 = vpack.c.bf16 %v665_v22, %v664_v19 }
 0x1e7   : > { %905 = vmatpush3.bf16.xpose.msra.mxu0 %v672_v59 }
 0x1e8   : > { %906 = vmatprep.subr.bf16.mxu0 %v950_v29 }
 0x1ef   : > { %907 = vmatpush3.bf16.xpose.msra.mxu0 %v673_v10 }
 0x1f0   : > { %908 = vmatprep.subr.bf16.mxu0 %v950_v29 }
 0x1f7   : > { %909 = vmatpush3.bf16.xpose.msra.mxu0 %v674_v9 }
 0x1f8   : > { %910 = vmatprep.subr.bf16.mxu0 %v950_v29 }
 0x1ff   : > { %911 = vmatpush3.bf16.xpose.msra.mxu0 %v675_v24 }
 0x200   : > { %912 = vmatprep.subr.bf16.mxu0 %v950_v29 }
 0x207   : > { %913 = vmatpush3.bf16.xpose.msra.mxu0 %v676_v23 }
 0x20e   : > { %915 = vmatmul.mubr.bf16.vlgmr.msra.gmra.mrb[0].mxu0 %v668_v25 }
 0x2e1   : > { %v717_v27 = vpop.f32.mrb[0].mxu0 }
 0x2e2   : > { %v718_v28 = vadd.f32 %v717_v27, %v681_v26  ;;  %v916_v30 = vpop.f32.mrb[1].mxu0 }
 0x2e3   : > { %v720_v31 = vpop.f32.mrb[2].mxu0 }
 0x2e4   : > { %723 = vst [vmem:[%s278_s20] sm:$0xff] %v718_v28  ;;  %v917_v29 = vpop.f32.mrb[3].mxu0 }
 0x2e5 PF: > { %s17_s24 = sadd.s32 1, %s948_s24  }
 0x2e6   : > { %p14_p5 = scmp.ge.s32.totalorder %s17_s24, 4  }
 0x2e8   :  { %16 = sbr.rel (!%p14_p5) target bundleno = 1 (0x1), region = 78 }

</bundles_post_ra>
